<compile_context>
chip_gen: v7x
topology: tpu7x:2x2x1
jax: 0.10.0
libtpu: 0.0.40
codegen_flags: <defaults>
</compile_context>

<pallas_src>
import functools

import jax
import jax.numpy as jnp
from jax.experimental import pallas as pl
from jax.experimental.pallas import tpu as pltpu


def _round_up(x: int, m: int) -> int:
    return ((x + m - 1) // m) * m


def actor_mlp_kernel(x_ref, w1_ref, b1_ref, w2_ref, b2_ref, w3_ref, b3_ref,
                     out_ref):
    # Hidden layer 1: [TB, obs] @ [obs, 128] + [1, 128] -> ReLU  (f32 accum)
    h1 = jnp.dot(x_ref[...], w1_ref[...], preferred_element_type=jnp.float32)
    h1 = jnp.maximum(h1 + b1_ref[...], 0.0)

    # Hidden layer 2: [TB, 128] @ [128, 256] + [1, 256] -> ReLU
    h2 = jnp.dot(h1.astype(w2_ref.dtype), w2_ref[...],
                 preferred_element_type=jnp.float32)
    h2 = jnp.maximum(h2 + b2_ref[...], 0.0)

    # Output logits: [TB, 256] @ [256, num_actions] + [1, num_actions]
    logits = jnp.dot(h2.astype(w3_ref.dtype), w3_ref[...],
                     preferred_element_type=jnp.float32)
    out_ref[...] = (logits + b3_ref[...]).astype(out_ref.dtype)


@functools.partial(jax.jit, static_argnames=("tile_b", "compute_dtype"))
def actor_forward(obs, params, *, tile_b: int = 512,
                  compute_dtype=jnp.float32):
    """obs: [B, num_observations] float32; params: dict of w1,b1,w2,b2,w3,b3.

    Returns logits [B, num_actions] in float32.
    """
    w1 = params["w1"].astype(compute_dtype)
    w2 = params["w2"].astype(compute_dtype)
    w3 = params["w3"].astype(compute_dtype)
    b1, b2, b3 = params["b1"], params["b2"], params["b3"]   # stay f32

    B, num_obs = obs.shape
    num_actions = w3.shape[1]

    # Batch tile: large (amortize ~0.35us/step grid overhead), multiple of 8
    # sublanes, capped so the grid keeps >=2 steps when B allows (so the
    # "parallel" axis can shard across v7x's two TensorCores). Tiny batches
    # (B <= 8) use a single full-array block (no divisibility requirement).
    if B <= 8:
        tb = B
    else:
        tb = min(tile_b, _round_up((B + 1) // 2, 8))
    grid_b = pl.cdiv(B, tb)

    x = obs.astype(compute_dtype)

    const2d = lambda i: (0, 0)        # weights / biases resident across steps
    batch_map = lambda i: (i, 0)      # stream batch tiles

    # Advisory cost hint so XLA schedules/overlaps this small kernel well.
    op_bytes = jnp.dtype(compute_dtype).itemsize
    flops = 2 * B * (num_obs * 128 + 128 * 256 + 256 * num_actions)
    bytes_accessed = (
        B * num_obs * op_bytes
        + (num_obs * 128 + 128 * 256 + 256 * num_actions) * op_bytes
        + (128 + 256 + num_actions) * 4
        + B * num_actions * 4)

    out = pl.pallas_call(
        actor_mlp_kernel,
        out_shape=jax.ShapeDtypeStruct((B, num_actions), jnp.float32),
        grid=(grid_b,),
        in_specs=[
            pl.BlockSpec((tb, num_obs), batch_map),      # obs tile
            pl.BlockSpec(w1.shape, const2d),             # w1 [obs, 128]
            pl.BlockSpec(b1.shape, const2d),             # b1 [1, 128]
            pl.BlockSpec(w2.shape, const2d),             # w2 [128, 256]
            pl.BlockSpec(b2.shape, const2d),             # b2 [1, 256]
            pl.BlockSpec(w3.shape, const2d),             # w3 [256, num_actions]
            pl.BlockSpec(b3.shape, const2d),             # b3 [1, num_actions]
        ],
        out_specs=pl.BlockSpec((tb, num_actions), batch_map),
        compiler_params=pltpu.CompilerParams(
            dimension_semantics=("parallel",),
        ),
        cost_estimate=pl.CostEstimate(
            flops=flops, transcendentals=0, bytes_accessed=bytes_accessed),
    )(x, w1, b1, w2, b2, w3, b3)

    return out


def reference_forward(obs, params, compute_dtype=jnp.float32):
    """Pure-JAX reference of the same math (same operand dtypes)."""
    w1 = params["w1"].astype(compute_dtype)
    w2 = params["w2"].astype(compute_dtype)
    w3 = params["w3"].astype(compute_dtype)
    h1 = jnp.dot(obs.astype(compute_dtype), w1,
                 preferred_element_type=jnp.float32) + params["b1"]
    h1 = jnp.maximum(h1, 0.0)
    h2 = jnp.dot(h1.astype(compute_dtype), w2,
                 preferred_element_type=jnp.float32) + params["b2"]
    h2 = jnp.maximum(h2, 0.0)
    return jnp.dot(h2.astype(compute_dtype), w3,
                   preferred_element_type=jnp.float32) + params["b3"]


def init_params(key, num_observations, num_actions):
    """Deterministic init mimicking PyTorch's default Linear init
    (uniform in [-1/sqrt(fan_in), 1/sqrt(fan_in)])."""
    dims = [(num_observations, 128), (128, 256), (256, num_actions)]
    params = {}
    for i, (fan_in, fan_out) in enumerate(dims, start=1):
        key, kw, kb = jax.random.split(key, 3)
        bound = 1.0 / jnp.sqrt(float(fan_in))
        params[f"w{i}"] = jax.random.uniform(
            kw, (fan_in, fan_out), jnp.float32, minval=-bound, maxval=bound)
        params[f"b{i}"] = jax.random.uniform(
            kb, (1, fan_out), jnp.float32, minval=-bound, maxval=bound)
    return params


if __name__ == "__main__":
    num_observations = 8
    num_actions = 4

    key = jax.random.PRNGKey(0)
    key, k_obs_small, k_obs_big = jax.random.split(key, 3)
    params = init_params(key, num_observations, num_actions)

    # Case 1: tiny demo batch (module-scale), f32 operands, single full block.
    obs_small = jax.random.normal(
        k_obs_small, (2, num_observations), jnp.float32)
    logits_small = actor_forward(obs_small, params)
    jax.block_until_ready(logits_small)
    ref_small = reference_forward(obs_small, params)
    assert logits_small.shape == (2, num_actions)
    assert jnp.allclose(logits_small, ref_small, atol=1e-5, rtol=1e-5)

    # Case 2: rollout-style batch not a multiple of the tile -> exercises the
    # 2-step grid and the masked ragged last tile (no wrapper-side padding).
    obs_big = jax.random.normal(
        k_obs_big, (200, num_observations), jnp.float32)
    logits_big = actor_forward(obs_big, params)
    jax.block_until_ready(logits_big)
    ref_big = reference_forward(obs_big, params)
    assert logits_big.shape == (200, num_actions)
    assert jnp.allclose(logits_big, ref_big, atol=1e-5, rtol=1e-5)

    # Case 3: bf16 operands (valid on v5e/v6e/v7x), f32 accumulation; compared
    # against a reference using identical operand dtypes.
    logits_bf16 = actor_forward(obs_big, params,
                                compute_dtype=jnp.bfloat16)
    jax.block_until_ready(logits_bf16)
    ref_bf16 = reference_forward(obs_big, params, compute_dtype=jnp.bfloat16)
    assert jnp.allclose(logits_bf16, ref_bf16, atol=5e-2, rtol=5e-2)

    print("KERNEL_OK")
</pallas_src>

<mosaic_0001>
module attributes {stable_mosaic.version = 11 : i64} {
  func.func @actor_mlp_kernel(%arg0: i32, %arg1: memref<2x8xf32, #tpu.memory_space<vmem>>, %arg2: memref<8x128xf32, #tpu.memory_space<vmem>>, %arg3: memref<1x128xf32, #tpu.memory_space<vmem>>, %arg4: memref<128x256xf32, #tpu.memory_space<vmem>>, %arg5: memref<1x256xf32, #tpu.memory_space<vmem>>, %arg6: memref<256x4xf32, #tpu.memory_space<vmem>>, %arg7: memref<1x4xf32, #tpu.memory_space<vmem>>, %arg8: memref<2x4xf32, #tpu.memory_space<vmem>>) attributes {dimension_semantics = [#tpu.dimension_semantics<parallel>], iteration_bounds = array<i64: 1>, scalar_prefetch = 0 : i64, scratch_operands = 0 : i64, tpu.core_type = #tpu.core_type<tc>, window_params = [{transform_indices = @transform_0, window_bounds = array<i64: 2, 8>}, {pipeline_mode = #tpu.pipeline_mode<synchronous>, transform_indices = @transform_1, window_bounds = array<i64: 8, 128>}, {pipeline_mode = #tpu.pipeline_mode<synchronous>, transform_indices = @transform_2, window_bounds = array<i64: 1, 128>}, {pipeline_mode = #tpu.pipeline_mode<synchronous>, transform_indices = @transform_3, window_bounds = array<i64: 128, 256>}, {pipeline_mode = #tpu.pipeline_mode<synchronous>, transform_indices = @transform_4, window_bounds = array<i64: 1, 256>}, {pipeline_mode = #tpu.pipeline_mode<synchronous>, transform_indices = @transform_5, window_bounds = array<i64: 256, 4>}, {pipeline_mode = #tpu.pipeline_mode<synchronous>, transform_indices = @transform_6, window_bounds = array<i64: 1, 4>}, {transform_indices = @transform_7, window_bounds = array<i64: 2, 4>}]} {
    %c0 = arith.constant 0 : index
    %c0_0 = arith.constant 0 : index
    %0 = vector.load %arg1[%c0, %c0_0] : memref<2x8xf32, #tpu.memory_space<vmem>>, vector<2x8xf32>
    %c0_1 = arith.constant 0 : index
    %c0_2 = arith.constant 0 : index
    %1 = vector.load %arg2[%c0_1, %c0_2] : memref<8x128xf32, #tpu.memory_space<vmem>>, vector<8x128xf32>
    %cst = arith.constant dense<0.000000e+00> : vector<2x128xf32>
    %2 = tpu.matmul %0, %1, %cst {dimension_numbers = #tpu.dot_dimension_numbers<[1], [0], [0], [1], [0, 0, 1, 1], [], []>} : vector<2x8xf32>, vector<8x128xf32>, vector<2x128xf32> -> vector<2x128xf32>
    %c0_3 = arith.constant 0 : index
    %c0_4 = arith.constant 0 : index
    %3 = vector.load %arg3[%c0_3, %c0_4] : memref<1x128xf32, #tpu.memory_space<vmem>>, vector<1x128xf32>
    %4 = vector.broadcast %3 : vector<1x128xf32> to vector<2x128xf32>
    %5 = arith.addf %2, %4 : vector<2x128xf32>
    %cst_5 = arith.constant 0.000000e+00 : f32
    %6 = vector.broadcast %cst_5 : f32 to vector<2x128xf32>
    %7 = arith.maximumf %5, %6 : vector<2x128xf32>
    %c0_6 = arith.constant 0 : index
    %c0_7 = arith.constant 0 : index
    %8 = vector.load %arg4[%c0_6, %c0_7] : memref<128x256xf32, #tpu.memory_space<vmem>>, vector<128x256xf32>
    %cst_8 = arith.constant dense<0.000000e+00> : vector<2x256xf32>
    %9 = tpu.matmul %7, %8, %cst_8 {dimension_numbers = #tpu.dot_dimension_numbers<[1], [0], [0], [1], [0, 0, 1, 1], [], []>} : vector<2x128xf32>, vector<128x256xf32>, vector<2x256xf32> -> vector<2x256xf32>
    %c0_9 = arith.constant 0 : index
    %c0_10 = arith.constant 0 : index
    %10 = vector.load %arg5[%c0_9, %c0_10] : memref<1x256xf32, #tpu.memory_space<vmem>>, vector<1x256xf32>
    %11 = vector.broadcast %10 : vector<1x256xf32> to vector<2x256xf32>
    %12 = arith.addf %9, %11 : vector<2x256xf32>
    %cst_11 = arith.constant 0.000000e+00 : f32
    %13 = vector.broadcast %cst_11 : f32 to vector<2x256xf32>
    %14 = arith.maximumf %12, %13 : vector<2x256xf32>
    %c0_12 = arith.constant 0 : index
    %c0_13 = arith.constant 0 : index
    %15 = vector.load %arg6[%c0_12, %c0_13] : memref<256x4xf32, #tpu.memory_space<vmem>>, vector<256x4xf32>
    %cst_14 = arith.constant dense<0.000000e+00> : vector<2x4xf32>
    %16 = tpu.matmul %14, %15, %cst_14 {dimension_numbers = #tpu.dot_dimension_numbers<[1], [0], [0], [1], [0, 0, 1, 1], [], []>} : vector<2x256xf32>, vector<256x4xf32>, vector<2x4xf32> -> vector<2x4xf32>
    %c0_15 = arith.constant 0 : index
    %c0_16 = arith.constant 0 : index
    %17 = vector.load %arg7[%c0_15, %c0_16] : memref<1x4xf32, #tpu.memory_space<vmem>>, vector<1x4xf32>
    %18 = vector.broadcast %17 : vector<1x4xf32> to vector<2x4xf32>
    %19 = arith.addf %16, %18 : vector<2x4xf32>
    %c0_17 = arith.constant 0 : index
    %c0_18 = arith.constant 0 : index
    %20 = vector.load %arg8[%c0_17, %c0_18] : memref<2x4xf32, #tpu.memory_space<vmem>>, vector<2x4xf32>
    tpu.vector_store %arg8[%c0_17, %c0_18], %19 {strides = array<i32>} : memref<2x4xf32, #tpu.memory_space<vmem>>, vector<2x4xf32>,
    return
  }
  func.func @transform_0(%arg0: i32) -> (i32, i32) {
    %c0_i32 = arith.constant 0 : i32
    %c0_i32_0 = arith.constant 0 : i32
    return %arg0, %c0_i32 : i32, i32
  }
  func.func @transform_1(%arg0: i32) -> (i32, i32) {
    %c0_i32 = arith.constant 0 : i32
    %c0_i32_0 = arith.constant 0 : i32
    %c0_i32_1 = arith.constant 0 : i32
    return %c0_i32, %c0_i32_0 : i32, i32
  }
  func.func @transform_2(%arg0: i32) -> (i32, i32) {
    %c0_i32 = arith.constant 0 : i32
    %c0_i32_0 = arith.constant 0 : i32
    %c0_i32_1 = arith.constant 0 : i32
    return %c0_i32, %c0_i32_0 : i32, i32
  }
  func.func @transform_3(%arg0: i32) -> (i32, i32) {
    %c0_i32 = arith.constant 0 : i32
    %c0_i32_0 = arith.constant 0 : i32
    %c0_i32_1 = arith.constant 0 : i32
    return %c0_i32, %c0_i32_0 : i32, i32
  }
  func.func @transform_4(%arg0: i32) -> (i32, i32) {
    %c0_i32 = arith.constant 0 : i32
    %c0_i32_0 = arith.constant 0 : i32
    %c0_i32_1 = arith.constant 0 : i32
    return %c0_i32, %c0_i32_0 : i32, i32
  }
  func.func @transform_5(%arg0: i32) -> (i32, i32) {
    %c0_i32 = arith.constant 0 : i32
    %c0_i32_0 = arith.constant 0 : i32
    %c0_i32_1 = arith.constant 0 : i32
    return %c0_i32, %c0_i32_0 : i32, i32
  }
  func.func @transform_6(%arg0: i32) -> (i32, i32) {
    %c0_i32 = arith.constant 0 : i32
    %c0_i32_0 = arith.constant 0 : i32
    %c0_i32_1 = arith.constant 0 : i32
    return %c0_i32, %c0_i32_0 : i32, i32
  }
  func.func @transform_7(%arg0: i32) -> (i32, i32) {
    %c0_i32 = arith.constant 0 : i32
    %c0_i32_0 = arith.constant 0 : i32
    return %arg0, %c0_i32 : i32, i32
  }
}

</mosaic_0001>

<bundles_post_ra>
// kernel: actor_forward.1
= control target key start
LH: loop header
LB: loop body
LE: loop exit
PB: predicated region body
PF: predicated region fallthrough
CT: control target
= control target key end

     0   :  { %vm36_vm0 = vcmask 64512   ;;  %v489_v2 = vmov 0.0   ;;  %vm490_vm1 = vmmov 0   ;;  %s751_s0 = inlined_call_operand.vmem [shape: f32[2,8], index: 0, kind: input, shape index: {}]   ;;  %s752_s1 = inlined_call_operand.vmem [shape: f32[8,128], index: 1, kind: input, shape index: {}]   ;;  %s753_s2 = inlined_call_operand.vmem [shape: f32[1,128], index: 2, kind: input, shape index: {}]   ;;  %s754_s3 = inlined_call_operand.vmem [shape: f32[128,256], index: 3, kind: input, shape index: {}]   ;;  %s755_s4 = inlined_call_operand.vmem [shape: f32[1,256], index: 4, kind: input, shape index: {}]   ;;  %s756_s5 = inlined_call_operand.vmem [shape: f32[256,4], index: 5, kind: input, shape index: {}]   ;;  %s757_s6 = inlined_call_operand.vmem [shape: f32[1,4], index: 6, kind: input, shape index: {}]   ;;  %s758_s7 = inlined_call_operand.hbm [shape: f32[2,4], index: 7, kind: output, shape index: {}]  }
   0x1   :  { %v28_v0 = vld [vmem:[%s752_s1] sm:$0xff]  ;;  %393 = vmatprep.subr.mxu0 %v489_v2  ;;  %395 = vmatprep.mubr.msk.f32.mxu0 %vm490_vm1, %v489_v2  ;;  %v112_v3 = vld [vmem:[%s754_s3 + $0x8] sm:$0xff]  ;;  %v114_v4 = vld [vmem:[%s754_s3 + $0x18] sm:$0xff] }
   0x2   :  { %v27_v1 = vld [vmem:[%s751_s0] sm:$0x3]  ;;  %394 = vmatpush3.msra.mxu0 %v28_v0  ;;  %v398_v6 = vpack.c.bf16 %v114_v4, %v112_v3  ;;  %v113_v7 = vld [vmem:[%s754_s3 + $0x10] sm:$0xff]  ;;  %v116_v8 = vld [vmem:[%s754_s3 + $0x28] sm:$0xff]  ;;  %219 = vmatprep.mubr.f32.mxu1 %v489_v2 }
   0x3   :  { %v111_v5 = vld [vmem:[%s754_s3] sm:$0xff]  ;;  %v118_v9 = vld [vmem:[%s754_s3 + $0x38] sm:$0xff]  ;;  %396 = vmatmul.mubr.msk.f32.vlgmr.msra.gmra.mrb[0].mxu0 %vm36_vm0, %v27_v1  ;;  %v117_v13 = vld [vmem:[%s754_s3 + $0x30] sm:$0xff] }
   0x4   :  { %v400_v10 = vpack.c.bf16 %v113_v7, %v111_v5  ;;  %v402_v11 = vpack.c.bf16 %v118_v9, %v116_v8  ;;  %v115_v12 = vld [vmem:[%s754_s3 + $0x20] sm:$0xff]  ;;  %v120_v14 = vld [vmem:[%s754_s3 + $0x48] sm:$0xff]  ;;  %399 = vmatprep.subr.bf16.mxu1 %v398_v6  ;;  %v122_v15 = vld [vmem:[%s754_s3 + $0x58] sm:$0xff] }
   0x5   :  { %v404_v16 = vpack.c.bf16 %v117_v13, %v115_v12  ;;  %v406_v17 = vpack.c.bf16 %v122_v15, %v120_v14  ;;  %v119_v18 = vld [vmem:[%s754_s3 + $0x40] sm:$0xff]  ;;  %v121_v19 = vld [vmem:[%s754_s3 + $0x50] sm:$0xff]  ;;  %v124_v20 = vld [vmem:[%s754_s3 + $0x68] sm:$0xff] }
   0x6   :  { %401 = vmatpush1.bf16.msra.mxu1 %v400_v10  ;;  %v126_v21 = vld [vmem:[%s754_s3 + $0x78] sm:$0xff]  ;;  %v408_v22 = vpack.c.bf16 %v121_v19, %v119_v18  ;;  %v123_v24 = vld [vmem:[%s754_s3 + $0x60] sm:$0xff]  ;;  %v125_v25 = vld [vmem:[%s754_s3 + $0x70] sm:$0xff] }
   0x7   :  { %403 = vmatprep.subr.bf16.mxu1 %v402_v11  ;;  %v410_v23 = vpack.c.bf16 %v126_v21, %v124_v20 }
   0xa   :  { %405 = vmatpush1.bf16.msra.mxu1 %v404_v16 }
   0xb   :  { %407 = vmatprep.subr.bf16.mxu1 %v406_v17 }
   0xc   :  { %12 = vsyncpa [#allocation3], 0  ;;  %v128_v26 = vld [vmem:[%s754_s3 + $0x88] sm:$0xff]  ;;  %v130_v27 = vld [vmem:[%s754_s3 + $0x98] sm:$0xff]  ;;  %v412_v28 = vpack.c.bf16 %v125_v25, %v123_v24  ;;  %s491_s9 = smov [#allocation2]   ;;  %vm337_vm2 = vcmask 25600  }
   0xd   :  { %v414_v29 = vpack.c.bf16 %v130_v27, %v128_v26  ;;  %v127_v30 = vld [vmem:[%s754_s3 + $0x80] sm:$0xff]  ;;  %v129_v31 = vld [vmem:[%s754_s3 + $0x90] sm:$0xff]  ;;  %v132_v32 = vld [vmem:[%s754_s3 + $0xa8] sm:$0xff]  ;;  %s345_s10 = sshll.u32 %s491_s9, 4  ;;  %s346_s10 = int_to_ptr.vmem [resolvable:$true] %s345_s10 }
   0xe   :  { %409 = vmatpush1.bf16.msra.mxu1 %v408_v22  ;;  %v134_v33 = vld [vmem:[%s754_s3 + $0xb8] sm:$0xff]  ;;  %v416_v34 = vpack.c.bf16 %v129_v31, %v127_v30  ;;  %v131_v36 = vld [vmem:[%s754_s3 + $0xa0] sm:$0xff]  ;;  %v133_v37 = vld [vmem:[%s754_s3 + $0xb0] sm:$0xff]  ;;  %p470_p1 = scmp.lt.s32.totalorder %s346_s10, %s346_s10 }
   0xf   :  { %411 = vmatprep.subr.bf16.mxu1 %v410_v23  ;;  %v418_v35 = vpack.c.bf16 %v134_v33, %v132_v32  ;;  %v136_v38 = vld [vmem:[%s754_s3 + $0xc8] sm:$0xff]  ;;  %v138_v39 = vld [vmem:[%s754_s3 + $0xd8] sm:$0xff]  ;;  %v420_v40 = vpack.c.bf16 %v133_v37, %v131_v36  ;;  %v135_v42 = vld [vmem:[%s754_s3 + $0xc0] sm:$0xff] }
  0x10   :  { %v422_v41 = vpack.c.bf16 %v138_v39, %v136_v38  ;;  %v137_v43 = vld [vmem:[%s754_s3 + $0xd0] sm:$0xff]  ;;  %v140_v45 = vld [vmem:[%s754_s3 + $0xe8] sm:$0xff]  ;;  %v142_v46 = vld [vmem:[%s754_s3 + $0xf8] sm:$0xff] }
  0x11   :  { %v424_v44 = vpack.c.bf16 %v137_v43, %v135_v42  ;;  %v426_v47 = vpack.c.bf16 %v142_v46, %v140_v45  ;;  %v139_v48 = vld [vmem:[%s754_s3 + $0xe0] sm:$0xff]  ;;  %v141_v49 = vld [vmem:[%s754_s3 + $0xf0] sm:$0xff]  ;;  %v245_v52 = vld [vmem:[%s756_s5 + $0x88] sm:$0xff] }
  0x12   :  { %413 = vmatpush1.bf16.msra.mxu1 %v412_v28  ;;  %v428_v50 = vpack.c.bf16 %v141_v49, %v139_v48  ;;  %v244_v51 = vld [vmem:[%s756_s5 + $0x80] sm:$0xff]  ;;  %v229_v55 = vld [vmem:[%s756_s5 + $0x8] sm:$0xff]  ;;  %v246_v56 = vld [vmem:[%s756_s5 + $0x90] sm:$0xff] }
  0x13   :  { %415 = vmatprep.subr.bf16.mxu1 %v414_v29  ;;  %v228_v53 = vld [vmem:[%s756_s5] sm:$0xff]  ;;  %v430_v54 = vpack.c.bf16 %v245_v52, %v244_v51  ;;  %v247_v57 = vld [vmem:[%s756_s5 + $0x98] sm:$0xff]  ;;  %v230_v60 = vld [vmem:[%s756_s5 + $0x10] sm:$0xff] }
  0x14   :  { %v432_v58 = vpack.c.bf16 %v229_v55, %v228_v53  ;;  %v434_v59 = vpack.c.bf16 %v247_v57, %v246_v56  ;;  %v231_v61 = vld [vmem:[%s756_s5 + $0x18] sm:$0xff]  ;;  %v248_v62 = vld [vmem:[%s756_s5 + $0xa0] sm:$0xff]  ;;  %v249_v63 = vld [vmem:[%s756_s5 + $0xa8] sm:$0xff] }
  0x15   :  { %431 = vmatprep.subr.bf16.mxu0 %v430_v54  ;;  %v436_v0 = vpack.c.bf16 %v231_v61, %v230_v60  ;;  %v438_v1 = vpack.c.bf16 %v249_v63, %v248_v62  ;;  %v232_v2 = vld [vmem:[%s756_s5 + $0x20] sm:$0xff]  ;;  %v233_v3 = vld [vmem:[%s756_s5 + $0x28] sm:$0xff]  ;;  %v250_v4 = vld [vmem:[%s756_s5 + $0xb0] sm:$0xff] }
  0x16   :  { %417 = vmatpush1.bf16.msra.mxu1 %v416_v34  ;;  %433 = vmatpush3.bf16.msra.mxu0 %v432_v58  ;;  %v251_v5 = vld [vmem:[%s756_s5 + $0xb8] sm:$0xff]  ;;  %v440_v6 = vpack.c.bf16 %v233_v3, %v232_v2  ;;  %v234_v8 = vld [vmem:[%s756_s5 + $0x30] sm:$0xff]  ;;  %v252_v10 = vld [vmem:[%s756_s5 + $0xc0] sm:$0xff] }
  0x17   :  { %419 = vmatprep.subr.bf16.mxu1 %v418_v35  ;;  %435 = vmatprep.subr.bf16.mxu0 %v434_v59  ;;  %v442_v7 = vpack.c.bf16 %v251_v5, %v250_v4  ;;  %v235_v9 = vld [vmem:[%s756_s5 + $0x38] sm:$0xff]  ;;  %v253_v11 = vld [vmem:[%s756_s5 + $0xc8] sm:$0xff]  ;;  %v236_v14 = vld [vmem:[%s756_s5 + $0x40] sm:$0xff] }
  0x18   :  { %v444_v12 = vpack.c.bf16 %v235_v9, %v234_v8  ;;  %v446_v13 = vpack.c.bf16 %v253_v11, %v252_v10  ;;  %v237_v15 = vld [vmem:[%s756_s5 + $0x48] sm:$0xff]  ;;  %v254_v16 = vld [vmem:[%s756_s5 + $0xd0] sm:$0xff]  ;;  %v255_v17 = vld [vmem:[%s756_s5 + $0xd8] sm:$0xff] }
  0x19   :  { %v448_v18 = vpack.c.bf16 %v237_v15, %v236_v14  ;;  %v450_v19 = vpack.c.bf16 %v255_v17, %v254_v16  ;;  %v238_v20 = vld [vmem:[%s756_s5 + $0x50] sm:$0xff]  ;;  %v239_v21 = vld [vmem:[%s756_s5 + $0x58] sm:$0xff]  ;;  %v256_v22 = vld [vmem:[%s756_s5 + $0xe0] sm:$0xff] }
  0x1a   :  { %421 = vmatpush1.bf16.msra.mxu1 %v420_v40  ;;  %437 = vmatpush3.bf16.msra.mxu0 %v436_v0  ;;  %v257_v23 = vld [vmem:[%s756_s5 + $0xe8] sm:$0xff]  ;;  %v452_v24 = vpack.c.bf16 %v239_v21, %v238_v20  ;;  %v353_v26 = vld [vmem:[%s753_s2] ss:$0 sm:$0xff]  ;;  %v258_v34 = vld [vmem:[%s756_s5 + $0xf0] sm:$0xff]  ;;  %v145_v40 = vlaneseq }
  0x1b   :  { %423 = vmatprep.subr.bf16.mxu1 %v422_v41  ;;  %439 = vmatprep.subr.bf16.mxu0 %v438_v1  ;;  %v454_v25 = vpack.c.bf16 %v257_v23, %v256_v22  ;;  %v240_v31 = vld [vmem:[%s756_s5 + $0x60] sm:$0xff]  ;;  %v241_v32 = vld [vmem:[%s756_s5 + $0x68] sm:$0xff]  ;;  %v259_v35 = vld [vmem:[%s756_s5 + $0xf8] sm:$0xff] }
  0x1c   :  { %v456_v33 = vpack.c.bf16 %v241_v32, %v240_v31  ;;  %v458_v36 = vpack.c.bf16 %v259_v35, %v258_v34  ;;  %v242_v37 = vld [vmem:[%s756_s5 + $0x70] sm:$0xff]  ;;  %v243_v38 = vld [vmem:[%s756_s5 + $0x78] sm:$0xff]  ;;  %v146_v41 = vshrl.u32 %v145_v40, 7  ;;  %v143_v43 = vld [vmem:[%s755_s4] sm:$0x3]  ;;  %s465_s4 = scalar_lea.vmem %s346_s10, 32 }
  0x1d   :  { %v460_v39 = vpack.c.bf16 %v243_v38, %v242_v37  ;;  %v355_v54 = vld [vmem:[%s757_s6] ss:$0 sm:$0xff]  ;;  %p466_p0 = scmp.ne.s32.totalorder %s346_s10, %s465_s4  ;;  %p471_p2 = scmp.lt.s32.totalorder %s465_s4, %s465_s4 }
  0x1e   :  { %425 = vmatpush1.bf16.msra.mxu1 %v424_v44  ;;  %441 = vmatpush3.bf16.msra.mxu0 %v440_v6  ;;  %v147_v42 = vsub.s32 0, %v146_v41  ;;  %v151_v44 = vsub.s32 1, %v146_v41 }
  0x1f   :  { %427 = vmatprep.subr.bf16.mxu1 %v426_v47  ;;  %443 = vmatprep.subr.bf16.mxu0 %v442_v7  ;;  %p472_p3 = por %p471_p2, %p470_p1 }
  0x20   :  { %v148_v45 = vrot.slane %v143_v43, %v147_v42  ;;  %v152_v46 = vrot.slane %v143_v43, %v151_v44 }
  0x21   :  { %p473_p4 = pnand %p472_p3, %p466_p0 }
  0x22   :  { %429 = vmatpush1.bf16.msra.mxu1 %v428_v50  ;;  %445 = vmatpush3.bf16.msra.mxu0 %v444_v12 }
  0x23   :  { %447 = vmatprep.subr.bf16.mxu0 %v446_v13 }
  0x26   :  { %449 = vmatpush3.bf16.msra.mxu0 %v448_v18 }
  0x27   :  { %451 = vmatprep.subr.bf16.mxu0 %v450_v19 }
  0x2a   :  { %453 = vmatpush3.bf16.msra.mxu0 %v452_v24 }
  0x2b   :  { %455 = vmatprep.subr.bf16.mxu0 %v454_v25 }
  0x2e   :  { %457 = vmatpush3.bf16.msra.mxu0 %v456_v33 }
  0x2f   :  { %459 = vmatprep.subr.bf16.mxu0 %v458_v36 }
  0x32   :  { %461 = vmatpush3.bf16.msra.mxu0 %v460_v39 }
  0xd6   :  { %v106_v27 = vpop.f32.mrb[0].mxu0 }
  0xd7   :  { %v107_v28 = vadd.f32 %v353_v26, %v106_v27  ;;  %v397_v29 = vpop.f32.mrb[1].mxu0 }
  0xd9   :  { %v110_v30 = vmax.f32 %v107_v28, 0.0 }
  0xdb   :  { %220 = vmatmul.mubr.f32.vlgmr.msra.gmra.mrb[0].mxu1 %v110_v30 }
 0x1ae   :  { %v221_v47 = vpop.f32.mrb[0].mxu1 }
 0x1af   :  { %v222_v48 = vadd.f32 %v221_v47, %v148_v45  ;;  %v223_v49 = vpop.f32.mrb[1].mxu1 }
 0x1b0   :  { %v224_v50 = vadd.f32 %v223_v49, %v152_v46 }
 0x1b1   :  { %v226_v52 = vmax.f32 %v222_v48, 0.0 }
 0x1b2   :  { %v227_v51 = vmax.f32 %v224_v50, 0.0 }
 0x1b4   :  { %331 = vmatprep.mubr.f32.mxu0 %v227_v51 }
 0x1b5   :  { %332 = vmatmul.mubr.f32.vlgmr.msra.gmra.mrb[2].mxu0 %v226_v52 }
 0x288   :  { %v390_v53 = vpop.f32.mrb[2].mxu0 }
 0x289   :  { %v391_v55 = vpop.f32.mrb[3].mxu0 }
 0x28a   :  { %v392_v56 = vadd.f32 %v391_v55, %v390_v53 }
 0x28c   :  { %v334_v57 = vadd.f32 %v392_v56, %v355_v54 }
 0x28e   :  { %338 = vst.msk [vmem:[#allocation2] sm:$0x3] %vm337_vm2, %v334_v57 }
 0x28f   :  { %476 = shalt.err (!%p473_p4)
}
 0x290   :  { %s477_s11 = scalar_lea.hbm %s758_s7, 32 }
 0x291   :  { %p478_p5 = scmp.ne.s32.totalorder %s758_s7, %s477_s11  ;;  %p481_p6 = scmp.lt.u32.totalorder %s477_s11, %s758_s7 }
 0x293   :  { %p483_p7 = pnand %p481_p6, %p478_p5 }
 0x295   :  { %486 = shalt.err (!%p483_p7)
}
 0x296   :  { %348 = dma.vmem_to_hbm [thread:$0]  %s346_s10, 32, %s758_s7, [#allocation3]  }
 0x297   :  { %487 = dma.done.wait [#allocation3], 32  }
 0x298   :  { %488 = vsyncadd [#allocation3], 4294967264 }
 0x299   :  { %352 = vsyncpa [#allocation3], 1 }

</bundles_post_ra>
